<compile_context>
chip_gen: v5e
topology: v5e:2x2
jax: 0.10.0
libtpu: 0.0.40
codegen_flags: <defaults>
</compile_context>

<pallas_src>
import functools

import jax
import jax.numpy as jnp
from jax.experimental import pallas as pl
from jax.experimental.pallas import tpu as pltpu


def _round_up(x, m):
    return ((x + m - 1) // m) * m


def cbow_linear_kernel(x_ref, w_ref, b_ref, out_ref):
    # x_ref:   (tm, D_pad)  bf16  mean context embeddings (batch-row tile)
    # w_ref:   (D_pad, tn)  bf16  linear weight tile, pre-transposed / padded
    # b_ref:   (1, tn)      f32   bias tile
    # out_ref: (tm, tn)     f32   logits tile
    acc = jnp.dot(x_ref[...], w_ref[...], preferred_element_type=jnp.float32)
    out_ref[...] = acc + b_ref[...]          # f32 epilogue, single lane-dense store


def pick_tiles(B, V, *, tm_desired=256, tn_desired=2048):
    """Pick batch/vocab tile sizes: tm multiple of 16 (bf16 sublane packing),
    tn multiple of 128 (multiple of 256 at real vocab sizes), both capped at
    the padded problem size so tiny demo shapes still work."""
    tm = min(tm_desired, _round_up(B, 16))
    tn = min(tn_desired, _round_up(V, 128))
    return tm, tn


def prepare_cbow_params(emb_table, lin_weight, lin_bias, *, tn, d_pad_to=128):
    """One-time parameter prep (off the per-call path):
      * embedding table cast to bf16 (halves the gather HBM stream),
      * linear weight transposed to (D_pad, V_pad), zero-padded on both the K
        (embedding) and N (vocab) axes, cast to bf16,
      * bias zero-padded to (1, V_pad) in f32."""
    V, D = emb_table.shape
    V_pad = _round_up(V, tn)
    D_pad = _round_up(D, d_pad_to)

    emb_bf16 = emb_table.astype(jnp.bfloat16)                          # (V, D) bf16

    w_t = jnp.zeros((D_pad, V_pad), dtype=jnp.bfloat16)
    w_t = w_t.at[:D, :V].set(lin_weight.T.astype(jnp.bfloat16))        # (D_pad, V_pad) bf16

    b = jnp.zeros((1, V_pad), dtype=jnp.float32)
    b = b.at[:, :V].set(lin_bias.astype(jnp.float32))                  # (1, V_pad) f32
    return emb_bf16, w_t, b


@functools.partial(jax.jit, static_argnames=("tm", "tn"))
def cbow_forward(inputs, emb_bf16, w_t_pad, b_pad, *, tm, tn):
    """inputs: (B, C) int32; emb_bf16: (V, D) bf16; w_t_pad: (D_pad, V_pad) bf16;
    b_pad: (1, V_pad) f32. Returns (B, V) f32 logits."""
    B, C = inputs.shape
    V, D = emb_bf16.shape
    D_pad, V_pad = w_t_pad.shape
    B_pad = _round_up(B, tm)

    # Embedding gather (bf16 stream) + mean over context in f32 (fused by XLA);
    # downcast to bf16 only AFTER the f32 mean, pad batch rows / K lanes with 0.
    mean = jnp.mean(emb_bf16[inputs].astype(jnp.float32), axis=1)       # (B, D) f32
    x = jnp.zeros((B_pad, D_pad), dtype=jnp.bfloat16)
    x = x.at[:B, :D].set(mean.astype(jnp.bfloat16))                     # (B_pad, D_pad) bf16

    n_vtiles = V_pad // tn
    n_btiles = B_pad // tm
    # Vocab OUTER, batch INNER: weight block index constant across the inner
    # loop -> the full (D_pad, V_pad) weight is DMA'd from HBM exactly once.
    grid = (n_vtiles, n_btiles)

    cost = pl.CostEstimate(
        flops=2 * B_pad * D_pad * V_pad,
        transcendentals=0,
        bytes_accessed=(
            D_pad * V_pad * 2                 # weight: streamed exactly once
            + n_vtiles * B_pad * D_pad * 2    # x: re-read once per vocab tile (tiny)
            + V_pad * 4                       # bias
            + B_pad * V_pad * 4               # logits write (f32)
        ),
    )

    out_pad = pl.pallas_call(
        cbow_linear_kernel,
        out_shape=jax.ShapeDtypeStruct((B_pad, V_pad), jnp.float32),
        grid=grid,
        in_specs=[
            pl.BlockSpec((tm, D_pad), lambda v, b: (b, 0)),   # batch tile of means
            pl.BlockSpec((D_pad, tn), lambda v, b: (0, v)),   # weight tile: changes only on OUTER axis
            pl.BlockSpec((1, tn), lambda v, b: (0, v)),       # bias tile
        ],
        out_specs=pl.BlockSpec((tm, tn), lambda v, b: (b, v)),
        compiler_params=pltpu.CompilerParams(
            dimension_semantics=("parallel", "parallel"),     # megacore / v7x 2-TC: vocab axis shards
            vmem_limit_bytes=48 * 1024 * 1024,                # >16 MiB v5e default, <64 MiB v7x VMEM
        ),
        cost_estimate=cost,
    )(x, w_t_pad, b_pad)

    # Strip lane/row padding back off.
    return out_pad[:B, :V]

# TODO(synk): optional v7x-only fp8(e4m3) weight stream with per-column scales
# in the epilogue, and bf16 logits output if the downstream loss tolerates it.


if __name__ == "__main__":
    # Small, deterministic setup consistent with the module:
    #   vocab_size V = 64, embedding_dim D = 32, batch B = 4, context C = 8
    V, D = 64, 32
    B, C = 4, 8

    # Auto-picked tiles: tm multiple of 16 capped at padded batch, tn multiple
    # of 128 (256+ at real vocab sizes) capped at padded vocab.
    tm, tn = pick_tiles(B, V)

    key = jax.random.PRNGKey(0)
    k_emb, k_w, k_b, k_idx = jax.random.split(key, 4)

    emb_table = jax.random.normal(k_emb, (V, D), dtype=jnp.float32)        # nn.Embedding weight
    lin_weight = jax.random.normal(k_w, (V, D), dtype=jnp.float32) * 0.1   # nn.Linear weight (V, D)
    lin_bias = jax.random.normal(k_b, (V,), dtype=jnp.float32) * 0.1       # nn.Linear bias (V,)

    inputs = jax.random.randint(k_idx, (B, C), 0, V, dtype=jnp.int32)      # (B, C) token ids

    # One-time parameter prep (transpose / pad / bf16-cast off the hot path).
    emb_bf16, w_t_pad, b_pad = prepare_cbow_params(emb_table, lin_weight, lin_bias, tn=tn)

    out = cbow_forward(inputs, emb_bf16, w_t_pad, b_pad, tm=tm, tn=tn)
    out = jax.block_until_ready(out)

    # References: exact bf16-matched reference (same casts as the kernel) and a
    # looser check against the pure-f32 PyTorch semantics.
    emb_bf16_as_f32 = emb_table.astype(jnp.bfloat16).astype(jnp.float32)
    mean_bf = emb_bf16_as_f32[inputs].mean(axis=1)
    ref_bf16 = (
        mean_bf.astype(jnp.bfloat16).astype(jnp.float32)
        @ lin_weight.T.astype(jnp.bfloat16).astype(jnp.float32)
    ) + lin_bias
    mean_f32 = emb_table[inputs].mean(axis=1)
    ref_f32 = mean_f32 @ lin_weight.T + lin_bias

    assert out.shape == (B, V)
    assert jnp.allclose(out, ref_bf16, atol=1e-4, rtol=1e-4), "mismatch vs bf16-matched reference"
    assert jnp.allclose(out, ref_f32, atol=3e-2, rtol=3e-2), "mismatch vs f32 reference"

    print("KERNEL_OK")
</pallas_src>

<mosaic_0001>
module attributes {stable_mosaic.version = 11 : i64} {
  func.func @cbow_linear_kernel(%arg0: i32, %arg1: i32, %arg2: memref<16x128xbf16, #tpu.memory_space<vmem>>, %arg3: memref<128x128xbf16, #tpu.memory_space<vmem>>, %arg4: memref<1x128xf32, #tpu.memory_space<vmem>>, %arg5: memref<16x128xf32, #tpu.memory_space<vmem>>) attributes {dimension_semantics = [#tpu.dimension_semantics<parallel>, #tpu.dimension_semantics<parallel>], iteration_bounds = array<i64: 1, 1>, scalar_prefetch = 0 : i64, scratch_operands = 0 : i64, tpu.core_type = #tpu.core_type<tc>, window_params = [{transform_indices = @transform_0, window_bounds = array<i64: 16, 128>}, {transform_indices = @transform_1, window_bounds = array<i64: 128, 128>}, {transform_indices = @transform_2, window_bounds = array<i64: 1, 128>}, {transform_indices = @transform_3, window_bounds = array<i64: 16, 128>}]} {
    %c0 = arith.constant 0 : index
    %c0_0 = arith.constant 0 : index
    %0 = vector.load %arg2[%c0, %c0_0] : memref<16x128xbf16, #tpu.memory_space<vmem>>, vector<16x128xbf16>
    %c0_1 = arith.constant 0 : index
    %c0_2 = arith.constant 0 : index
    %1 = vector.load %arg3[%c0_1, %c0_2] : memref<128x128xbf16, #tpu.memory_space<vmem>>, vector<128x128xbf16>
    %cst = arith.constant dense<0.000000e+00> : vector<16x128xf32>
    %2 = tpu.matmul %0, %1, %cst {dimension_numbers = #tpu.dot_dimension_numbers<[1], [0], [0], [1], [0, 0, 1, 1], [], []>} : vector<16x128xbf16>, vector<128x128xbf16>, vector<16x128xf32> -> vector<16x128xf32>
    %c0_3 = arith.constant 0 : index
    %c0_4 = arith.constant 0 : index
    %3 = vector.load %arg4[%c0_3, %c0_4] : memref<1x128xf32, #tpu.memory_space<vmem>>, vector<1x128xf32>
    %4 = vector.broadcast %3 : vector<1x128xf32> to vector<16x128xf32>
    %5 = arith.addf %2, %4 : vector<16x128xf32>
    %c0_5 = arith.constant 0 : index
    %c0_6 = arith.constant 0 : index
    %6 = vector.load %arg5[%c0_5, %c0_6] : memref<16x128xf32, #tpu.memory_space<vmem>>, vector<16x128xf32>
    tpu.vector_store %arg5[%c0_5, %c0_6], %5 {strides = array<i32>} : memref<16x128xf32, #tpu.memory_space<vmem>>, vector<16x128xf32>,
    return
  }
  func.func @transform_0(%arg0: i32, %arg1: i32) -> (i32, i32) {
    %c0_i32 = arith.constant 0 : i32
    %c0_i32_0 = arith.constant 0 : i32
    return %arg1, %c0_i32 : i32, i32
  }
  func.func @transform_1(%arg0: i32, %arg1: i32) -> (i32, i32) {
    %c0_i32 = arith.constant 0 : i32
    %c0_i32_0 = arith.constant 0 : i32
    return %c0_i32, %arg0 : i32, i32
  }
  func.func @transform_2(%arg0: i32, %arg1: i32) -> (i32, i32) {
    %c0_i32 = arith.constant 0 : i32
    %c0_i32_0 = arith.constant 0 : i32
    return %c0_i32, %arg0 : i32, i32
  }
  func.func @transform_3(%arg0: i32, %arg1: i32) -> (i32, i32) {
    %c0_i32 = arith.constant 0 : i32
    return %arg1, %arg0 : i32, i32
  }
}

</mosaic_0001>

<bundles_post_ra>
// kernel: cbow_forward.1
= control target key start
LH: loop header
LB: loop body
LE: loop exit
PB: predicated region body
PF: predicated region fallthrough
CT: control target
= control target key end

     0   :  { %s212_s1 = inlined_call_operand.vmem [shape: bf16[128,128], index: 1, kind: input, shape index: {}]   ;;  %s213_s2 = inlined_call_operand.vmem [shape: f32[1,128], index: 2, kind: input, shape index: {}]   ;;  %s214_s0 = inlined_call_operand.vmem [shape: bf16[16,128], index: 0, kind: input, shape index: {}]   ;;  %s215_s3 = inlined_call_operand.vmem [shape: f32[16,128], index: 3, kind: output, shape index: {}]  }
   0x1   :  { %v154_v0 = vld [vmem:[%s212_s1 + $0x38] sm:$0xff]  ;;  %v153_v1 = vld [vmem:[%s212_s1 + $0x30] sm:$0xff]  ;;  %v152_v2 = vld [vmem:[%s212_s1 + $0x28] sm:$0xff] }
   0x2   :  { %90 = vmatpush.bf16.msra.mxu0 %v154_v0  ;;  %v151_v3 = vld [vmem:[%s212_s1 + $0x20] sm:$0xff]  ;;  %v150_v4 = vld [vmem:[%s212_s1 + $0x18] sm:$0xff]  ;;  %v149_v5 = vld [vmem:[%s212_s1 + $0x10] sm:$0xff] }
   0x3   :  { %v148_v6 = vld [vmem:[%s212_s1 + $0x8] sm:$0xff]  ;;  %v147_v7 = vld [vmem:[%s212_s1] sm:$0xff] }
   0x4   :  { %v146_v8 = vld [vmem:[%s214_s0] sm:$0xff] }
   0x5   :  { %v155_v9 = vld [vmem:[%s213_s2] ss:$0 sm:$0xff] }
   0x6   :  { %91 = vmatpush.bf16.msra.mxu0 %v153_v1 }
   0xa   :  { %92 = vmatpush.bf16.msra.mxu0 %v152_v2 }
   0xe   :  { %93 = vmatpush.bf16.msra.mxu0 %v151_v3 }
  0x12   :  { %94 = vmatpush.bf16.msra.mxu0 %v150_v4 }
  0x16   :  { %95 = vmatpush.bf16.msra.mxu0 %v149_v5 }
  0x1a   :  { %96 = vmatpush.bf16.msra.mxu0 %v148_v6 }
  0x1e   :  { %97 = vmatpush.bf16.msra.mxu0 %v147_v7 }
  0x21   :  { %98 = vmatmul.bf16.vlgmr.msra.gmra.mxu0 %v146_v8 }
  0x9e   :  { %v99_v10 = vpop.f32.mrf.mxu0 }
  0x9f   :  { %v100_v11 = vadd.f32 %v155_v9, %v99_v10 }
  0xa1   :  { %104 = vst [vmem:[%s215_s3] sm:$0xff] %v100_v11 }
  0xa6   :  { %v101_v12 = vpop.f32.mrf.mxu0 }
  0xa7   :  { %v102_v13 = vadd.f32 %v155_v9, %v101_v12 }
  0xa9   :  { %105 = vst [vmem:[%s215_s3 + $0x8] sm:$0xff] %v102_v13 }

</bundles_post_ra>
